<compile_context>
chip_gen: v5e
topology: v5e:2x2
jax: 0.10.0
libtpu: 0.0.40
codegen_flags: <defaults>
</compile_context>

<pallas_src>
import functools

import jax
import jax.numpy as jnp
from jax.experimental import pallas as pl
from jax.experimental.pallas import tpu as pltpu


def _nce_rce_kernel(x_ref, y_ref, out_ref, *, alpha: float, beta: float,
                    n_rows: int, mean_mode: bool):
    """One (TN, C) tile: per-row alpha*nce + beta*rce (or its masked partial sum)."""
    x = x_ref[...].astype(jnp.float32)   # [TN, C] logits
    y = y_ref[...].astype(jnp.float32)   # [TN, C] soft targets
    tn, c = x.shape

    # Stable softmax pieces — no full-tile log_softmax materialization.
    m = jnp.max(x, axis=-1, keepdims=True)            # XLU lane reduce
    z = x - m
    ez = jnp.exp(z)                                    # EUP, ez <= 1
    sum_ez = jnp.sum(ez, axis=-1, keepdims=True)       # [TN,1]
    log_sum_ez = jnp.log(sum_ez)                       # [TN,1]
    inv_sum_ez = 1.0 / sum_ez                          # exact; tiny [TN,1] vector

    # NCE folded:  -sum_c logp      = C*log_sum - sum_c z
    #              -sum_c y*logp    = log_sum*sum_c y - sum_c y*z
    sum_z = jnp.sum(z, axis=-1, keepdims=True)
    sum_y = jnp.sum(y, axis=-1, keepdims=True)
    sum_yz = jnp.sum(y * z, axis=-1, keepdims=True)
    nce_num = log_sum_ez * sum_y - sum_yz
    nce_den = float(c) * log_sum_ez - sum_z

    # RCE: -sum_c clamp(softmax,1e-7,1) * log(clamp(y,1e-4,1))
    p_c = jnp.clip(ez * inv_sum_ez, 1e-7, 1.0)
    log_yc = jnp.log(jnp.clip(y, 1e-4, 1.0))
    rce = -jnp.sum(p_c * log_yc, axis=-1, keepdims=True)

    row_loss = alpha * (nce_num / nce_den) + beta * rce   # [TN, 1]

    if mean_mode:
        # Padded rows (>= n_rows) of the last partial block may hold garbage
        # (exp/log of stale VMEM) -> select them out BEFORE summing across rows.
        row_ids = (jax.lax.broadcasted_iota(jnp.int32, row_loss.shape, 0)
                   + pl.program_id(0) * tn)
        masked = jnp.where(row_ids < n_rows, row_loss, 0.0)
        psum = jnp.sum(masked, axis=0, keepdims=True)      # [1,1] partial sum
        sub = jax.lax.broadcasted_iota(jnp.int32, (8, 1), 0)
        out_ref[...] = jnp.where(sub == 0, psum, 0.0)      # (8,1) block, row 0
    else:
        out_ref[...] = row_loss


def _vmem_capacity_bytes() -> int:
    try:
        return int(pltpu.get_tpu_info().vmem_capacity_bytes)
    except Exception:
        return 64 * 1024 * 1024   # conservative: v7x per-TensorCore VMEM


def _choose_row_tile(n: int, c: int) -> int:
    """Row tile (multiple of 8): generation-aware size with a >=4-step grid cap."""
    vmem = _vmem_capacity_bytes()
    # ~4 MiB f32 per input tile on 128 MiB parts (v5e/v6e), ~2 MiB on 64 MiB (v7x).
    target_elems = (1024 * 1024) if vmem >= (96 << 20) else (512 * 1024)
    tn = max(8, (target_elems // max(c, 1)) // 8 * 8)
    tn = min(tn, 1024)
    if n >= 32:
        # Guarantee >= ~4 grid steps: DMA/compute pipelining + both v7x TCs get work.
        cap = max(8, (-(-n // 4)) // 8 * 8)
        tn = min(tn, cap)
    if tn >= n:
        tn = n   # tiny-N: single full-extent block is unavoidable
    # TODO(synk): for very large C (~100k+ classes) tile the class axis too
    # (grid=(rows, C//tc) with an online-softmax carry in VMEM scratch); the
    # current row-only tiling assumes an 8-row tile fits the VMEM budget.
    return tn


def _vmem_limit_bytes(tn: int, c: int, pred_dtype, labels_dtype) -> int:
    """Scoped-VMEM limit sized from the actual footprint (+ margin), per-chip capped."""
    in_tile = tn * c * (jnp.dtype(pred_dtype).itemsize
                        + jnp.dtype(labels_dtype).itemsize)
    pipeline = 2 * in_tile                 # double-buffered input windows
    temps = 8 * tn * c * 4                 # generous bound on in-kernel f32 temporaries
    limit = pipeline + temps + (2 << 20)   # + margin for outputs / compiler scratch
    limit = max(limit, 32 << 20)           # never below the usual scoped default
    return int(min(limit, _vmem_capacity_bytes() - (8 << 20)))


def nce_and_rce_loss(pred, labels, alpha=1.0, beta=1.0, reduction="mean",
                     row_tile=None):
    """pred, labels: [N, C]. Returns scalar f32 ('mean') or per-row f32[N] ('none').

    bf16 or f32 inputs are accepted; pass bf16 straight through when the producer
    already emits bf16 (the kernel upcasts on load) — do not pre-cast in the
    wrapper, that would add an extra un-hidden HBM pass.
    """
    if reduction not in ("mean", "none"):
        raise NotImplementedError(reduction)
    n, c = pred.shape
    assert labels.shape == (n, c), (pred.shape, labels.shape)

    tn = _choose_row_tile(n, c) if row_tile is None else max(1, min(int(row_tile), n))
    num_tiles = pl.cdiv(n, tn)
    mean_mode = reduction == "mean"

    kernel = functools.partial(_nce_rce_kernel, alpha=float(alpha),
                               beta=float(beta), n_rows=n, mean_mode=mean_mode)

    if mean_mode:
        # One masked partial sum per grid step, padded into an (8,1) block so the
        # output BlockSpec stays tile-legal for any number of tiles.
        out_shape = jax.ShapeDtypeStruct((num_tiles * 8, 1), jnp.float32)
        out_spec = pl.BlockSpec((8, 1), lambda i: (i, 0))
    else:
        out_shape = jax.ShapeDtypeStruct((n, 1), jnp.float32)
        out_spec = pl.BlockSpec((tn, 1), lambda i: (i, 0))

    out = pl.pallas_call(
        kernel,
        out_shape=out_shape,
        grid_spec=pl.GridSpec(
            grid=(num_tiles,),
            in_specs=[pl.BlockSpec((tn, c), lambda i: (i, 0)),
                      pl.BlockSpec((tn, c), lambda i: (i, 0))],
            out_specs=out_spec,
        ),
        compiler_params=pltpu.CompilerParams(
            dimension_semantics=("parallel",),   # rows independent, no carry
            vmem_limit_bytes=_vmem_limit_bytes(tn, c, pred.dtype, labels.dtype),
        ),
    )(pred, labels)

    if mean_mode:
        return jnp.sum(out) / jnp.float32(n)
    return out[:, 0]


def _reference(pred, labels, alpha=1.0, beta=1.0, reduction="mean"):
    """Pure-JAX reference mirroring the PyTorch NCEandRCE module."""
    x = pred.astype(jnp.float32)
    y = labels.astype(jnp.float32)
    logp = jax.nn.log_softmax(x, axis=-1)
    nce = (-jnp.sum(y * logp, axis=-1)) / (-jnp.sum(logp, axis=-1))
    p = jnp.clip(jax.nn.softmax(x, axis=-1), 1e-7, 1.0)
    y_c = jnp.clip(y, 1e-4, 1.0)
    rce = -jnp.sum(jnp.log(y_c) * p, axis=-1)
    per_row = alpha * nce + beta * rce
    return jnp.mean(per_row) if reduction == "mean" else per_row


if __name__ == "__main__":
    key = jax.random.PRNGKey(0)
    k1, k2, k3, k4 = jax.random.split(key, 4)

    # Small shape consistent with the loss module: batch=8, num_classes=32.
    N, C = 8, 32
    pred = jax.random.normal(k1, (N, C), dtype=jnp.float32)
    labels = jax.nn.softmax(
        3.0 * jax.random.normal(k2, (N, C), dtype=jnp.float32), axis=-1)

    loss = nce_and_rce_loss(pred, labels, alpha=1.0, beta=1.0)
    jax.block_until_ready(loss)
    ref = _reference(pred, labels, alpha=1.0, beta=1.0)
    assert jnp.allclose(loss, ref, rtol=1e-4, atol=1e-4), (loss, ref)

    # Multi-tile 'mean' path with a partial final block (N % tile != 0),
    # exercising the heuristic tile chooser and the masked per-tile partial sums.
    N2, C2 = 100, 32
    pred2 = jax.random.normal(k3, (N2, C2), dtype=jnp.float32)
    labels2 = jax.nn.softmax(
        3.0 * jax.random.normal(k4, (N2, C2), dtype=jnp.float32), axis=-1)
    loss2 = nce_and_rce_loss(pred2, labels2, alpha=1.0, beta=1.0)
    jax.block_until_ready(loss2)
    ref2 = _reference(pred2, labels2, alpha=1.0, beta=1.0)
    assert jnp.allclose(loss2, ref2, rtol=1e-4, atol=1e-4), (loss2, ref2)

    # Per-row ('none') path.
    per_row = nce_and_rce_loss(pred2, labels2, reduction="none")
    jax.block_until_ready(per_row)
    ref_rows = _reference(pred2, labels2, reduction="none")
    assert per_row.shape == (N2,)
    assert jnp.allclose(per_row, ref_rows, rtol=1e-4, atol=1e-4)

    # bf16 inputs (halved HBM traffic); math stays f32 in-kernel.
    loss_bf16 = nce_and_rce_loss(pred2.astype(jnp.bfloat16),
                                 labels2.astype(jnp.bfloat16))
    jax.block_until_ready(loss_bf16)
    ref_bf16 = _reference(pred2.astype(jnp.bfloat16), labels2.astype(jnp.bfloat16))
    assert jnp.allclose(loss_bf16, ref_bf16, rtol=1e-3, atol=1e-3), (loss_bf16, ref_bf16)

    print("KERNEL_OK")
</pallas_src>

<mosaic_0001>
module attributes {stable_mosaic.version = 11 : i64} {
  func.func @_nce_rce_kernel(%arg0: i32, %arg1: memref<8x32xf32, #tpu.memory_space<vmem>>, %arg2: memref<8x32xf32, #tpu.memory_space<vmem>>, %arg3: memref<8x1xf32, #tpu.memory_space<vmem>>) attributes {dimension_semantics = [#tpu.dimension_semantics<parallel>], iteration_bounds = array<i64: 1>, scalar_prefetch = 0 : i64, scratch_operands = 0 : i64, tpu.core_type = #tpu.core_type<tc>, window_params = [{transform_indices = @transform_0, window_bounds = array<i64: 8, 32>}, {transform_indices = @transform_1, window_bounds = array<i64: 8, 32>}, {transform_indices = @transform_2, window_bounds = array<i64: 8, 1>}]} {
    %c0 = arith.constant 0 : index
    %c0_0 = arith.constant 0 : index
    %0 = vector.load %arg1[%c0, %c0_0] : memref<8x32xf32, #tpu.memory_space<vmem>>, vector<8x32xf32>
    %c0_1 = arith.constant 0 : index
    %c0_2 = arith.constant 0 : index
    %1 = vector.load %arg2[%c0_1, %c0_2] : memref<8x32xf32, #tpu.memory_space<vmem>>, vector<8x32xf32>
    %cst = arith.constant dense<0xFF800000> : vector<8xf32>
    %2 = vector.multi_reduction <maximumf>, %0, %cst [1] : vector<8x32xf32> to vector<8xf32>
    %3 = vector.shape_cast %2 : vector<8xf32> to vector<8x1xf32>
    %4 = vector.broadcast %3 : vector<8x1xf32> to vector<8x32xf32>
    %5 = arith.subf %0, %4 : vector<8x32xf32>
    %6 = math.exp %5 : vector<8x32xf32>
    %cst_3 = arith.constant dense<0.000000e+00> : vector<8xf32>
    %7 = vector.multi_reduction <add>, %6, %cst_3 [1] : vector<8x32xf32> to vector<8xf32>
    %8 = vector.shape_cast %7 : vector<8xf32> to vector<8x1xf32>
    %9 = math.log %8 : vector<8x1xf32>
    %cst_4 = arith.constant 1.000000e+00 : f32
    %10 = vector.broadcast %cst_4 : f32 to vector<8x1xf32>
    %11 = arith.divf %10, %8 : vector<8x1xf32>
    %cst_5 = arith.constant dense<0.000000e+00> : vector<8xf32>
    %12 = vector.multi_reduction <add>, %5, %cst_5 [1] : vector<8x32xf32> to vector<8xf32>
    %13 = vector.shape_cast %12 : vector<8xf32> to vector<8x1xf32>
    %cst_6 = arith.constant dense<0.000000e+00> : vector<8xf32>
    %14 = vector.multi_reduction <add>, %1, %cst_6 [1] : vector<8x32xf32> to vector<8xf32>
    %15 = vector.shape_cast %14 : vector<8xf32> to vector<8x1xf32>
    %16 = arith.mulf %1, %5 : vector<8x32xf32>
    %cst_7 = arith.constant dense<0.000000e+00> : vector<8xf32>
    %17 = vector.multi_reduction <add>, %16, %cst_7 [1] : vector<8x32xf32> to vector<8xf32>
    %18 = vector.shape_cast %17 : vector<8xf32> to vector<8x1xf32>
    %19 = arith.mulf %9, %15 : vector<8x1xf32>
    %20 = arith.subf %19, %18 : vector<8x1xf32>
    %cst_8 = arith.constant 3.200000e+01 : f32
    %21 = vector.broadcast %cst_8 : f32 to vector<8x1xf32>
    %22 = arith.mulf %21, %9 : vector<8x1xf32>
    %23 = arith.subf %22, %13 : vector<8x1xf32>
    %24 = vector.broadcast %11 : vector<8x1xf32> to vector<8x32xf32>
    %25 = arith.mulf %6, %24 : vector<8x32xf32>
    %cst_9 = arith.constant 1.000000e-07 : f32
    %cst_10 = arith.constant 1.000000e+00 : f32
    %26 = vector.broadcast %cst_9 : f32 to vector<8x32xf32>
    %27 = arith.maximumf %26, %25 : vector<8x32xf32>
    %28 = vector.broadcast %cst_10 : f32 to vector<8x32xf32>
    %29 = arith.minimumf %28, %27 : vector<8x32xf32>
    %cst_11 = arith.constant 9.99999974E-5 : f32
    %cst_12 = arith.constant 1.000000e+00 : f32
    %30 = vector.broadcast %cst_11 : f32 to vector<8x32xf32>
    %31 = arith.maximumf %30, %1 : vector<8x32xf32>
    %32 = vector.broadcast %cst_12 : f32 to vector<8x32xf32>
    %33 = arith.minimumf %32, %31 : vector<8x32xf32>
    %34 = math.log %33 : vector<8x32xf32>
    %35 = arith.mulf %29, %34 : vector<8x32xf32>
    %cst_13 = arith.constant dense<0.000000e+00> : vector<8xf32>
    %36 = vector.multi_reduction <add>, %35, %cst_13 [1] : vector<8x32xf32> to vector<8xf32>
    %37 = vector.shape_cast %36 : vector<8xf32> to vector<8x1xf32>
    %cst_14 = arith.constant 0.000000e+00 : f32
    %38 = vector.broadcast %cst_14 : f32 to vector<8x1xf32>
    %39 = arith.subf %38, %37 : vector<8x1xf32>
    %40 = arith.divf %20, %23 : vector<8x1xf32>
    %cst_15 = arith.constant 1.000000e+00 : f32
    %41 = vector.broadcast %cst_15 : f32 to vector<8x1xf32>
    %42 = arith.mulf %41, %40 : vector<8x1xf32>
    %cst_16 = arith.constant 1.000000e+00 : f32
    %43 = vector.broadcast %cst_16 : f32 to vector<8x1xf32>
    %44 = arith.mulf %43, %39 : vector<8x1xf32>
    %45 = arith.addf %42, %44 : vector<8x1xf32>
    %46 = tpu.iota {dimensions = array<i32: 0>} : vector<8x1xi32>
    %c8_i32 = arith.constant 8 : i32
    %47 = arith.muli %arg0, %c8_i32 : i32
    %48 = vector.broadcast %47 : i32 to vector<8x1xi32>
    %49 = arith.addi %46, %48 : vector<8x1xi32>
    %c8_i32_17 = arith.constant 8 : i32
    %50 = vector.broadcast %c8_i32_17 : i32 to vector<8x1xi32>
    %51 = arith.cmpi slt, %49, %50 : vector<8x1xi32>
    %cst_18 = arith.constant 0.000000e+00 : f32
    %52 = vector.broadcast %cst_18 : f32 to vector<8x1xf32>
    %53 = arith.select %51, %45, %52 : vector<8x1xi1>, vector<8x1xf32>
    %cst_19 = arith.constant dense<0.000000e+00> : vector<1xf32>
    %54 = vector.multi_reduction <add>, %53, %cst_19 [0] : vector<8x1xf32> to vector<1xf32>
    %55 = vector.shape_cast %54 : vector<1xf32> to vector<1x1xf32>
    %56 = tpu.iota {dimensions = array<i32: 0>} : vector<8x1xi32>
    %c0_i32 = arith.constant 0 : i32
    %57 = vector.broadcast %c0_i32 : i32 to vector<8x1xi32>
    %58 = arith.cmpi eq, %56, %57 : vector<8x1xi32>
    %cst_20 = arith.constant 0.000000e+00 : f32
    %59 = vector.shape_cast %55 : vector<1x1xf32> to vector<1x1xf32>
    %60 = vector.broadcast %59 : vector<1x1xf32> to vector<8x1xf32>
    %61 = vector.broadcast %cst_20 : f32 to vector<8x1xf32>
    %62 = arith.select %58, %60, %61 : vector<8x1xi1>, vector<8x1xf32>
    %c0_21 = arith.constant 0 : index
    %c0_22 = arith.constant 0 : index
    %63 = vector.load %arg3[%c0_21, %c0_22] : memref<8x1xf32, #tpu.memory_space<vmem>>, vector<8x1xf32>
    tpu.vector_store %arg3[%c0_21, %c0_22], %62 {strides = array<i32>} : memref<8x1xf32, #tpu.memory_space<vmem>>, vector<8x1xf32>,
    return
  }
  func.func @transform_0(%arg0: i32) -> (i32, i32) {
    %c0_i32 = arith.constant 0 : i32
    %c0_i32_0 = arith.constant 0 : i32
    return %arg0, %c0_i32 : i32, i32
  }
  func.func @transform_1(%arg0: i32) -> (i32, i32) {
    %c0_i32 = arith.constant 0 : i32
    %c0_i32_0 = arith.constant 0 : i32
    return %arg0, %c0_i32 : i32, i32
  }
  func.func @transform_2(%arg0: i32) -> (i32, i32) {
    %c0_i32 = arith.constant 0 : i32
    %c0_i32_0 = arith.constant 0 : i32
    return %arg0, %c0_i32 : i32, i32
  }
}

</mosaic_0001>

<bundles_post_ra>
// kernel: tpu_custom_call.1
= control target key start
LH: loop header
LB: loop body
LE: loop exit
PB: predicated region body
PF: predicated region fallthrough
CT: control target
= control target key end

     0   :  { %7 = vsyncpa [#allocation3], 0  ;;  %s229_s0 = inlined_call_operand.hbm [shape: f32[8,32], index: 0, kind: input, shape index: {}]   ;;  %s230_s1 = inlined_call_operand.hbm [shape: f32[8,32], index: 1, kind: input, shape index: {}]   ;;  %s231_s2 = inlined_call_operand.vmem [shape: f32[8,1], index: 2, kind: output, shape index: {}]  }
   0x1   :  { %s14_s11 = sshll.u32 %s229_s0, 4  ;;  %s15_s11 = int_to_ptr.hbm [resolvable:$true] %s14_s11 }
   0x2   :  { %8 = vsyncpa [#allocation5], 0  ;;  %s197_s12 = smov [#allocation2]   ;;  %s25_s16 = sshll.u32 %s230_s1, 4  ;;  %s26_s16 = int_to_ptr.hbm [resolvable:$true] %s25_s16 }
   0x3   :  { %s16_s13 = sshll.u32 %s197_s12, 4  ;;  %s198_s17 = smov [#allocation4]   ;;  %s17_s13 = int_to_ptr.vmem [resolvable:$true] %s16_s13 }
   0x4   :  { %19 = dma.hbm_to_vmem [thread:$0]  %s15_s11, 128, %s17_s13, [#allocation3]  }
   0x5   :  { %s27_s18 = sshll.u32 %s198_s17, 4  ;;  %s28_s18 = int_to_ptr.vmem [resolvable:$true] %s27_s18 }
   0x6   :  { %30 = dma.hbm_to_vmem [thread:$0]  %s26_s16, 128, %s28_s18, [#allocation5]  }
   0x7   :  { %193 = dma.done.wait [#allocation3], 128  }
   0x8   :  { %194 = vsyncadd [#allocation3], 4294967168 }
   0x9   :  { %195 = dma.done.wait [#allocation5], 128  }
   0xa   :  { %196 = vsyncadd [#allocation5], 4294967168  ;;  %vm41_vm0 = vcmask 261120   ;;  %v39_v0 = vld [vmem:[#allocation2] sm:$0xff]  ;;  %v40_v3 = vld [vmem:[#allocation4] sm:$0xff]  ;;  %v110_v56 = vlaneseq  ;;  %vm125_vm10 = vcmask 7168  }
   0xb   :  { %v42_v1 = vsel %vm41_vm0, %v39_v0, -inf  ;;  %v71_v9 = vsel %vm41_vm0, %v40_v3, 0.0  ;;  %v85_v13 = vmax.f32 %v40_v3, 0.0001 }
   0xc   :  { %43 = vmax.xlane.f32.xlu0 %v42_v1  ;;  %v111_v59 = vshrl.u32 %v110_v56, 7 }
   0xd   :  { %v86_v15 = vmin.f32 %v85_v13, 1.0 }
   0xe   :  { %vm123_vm9 = vcmp.eq.s32.totalorder %v111_v59, 0 }
  0x7f   :  { %v44_v2 = vpop.xlane.xlu0 %43 }
  0x80   :  { %v45_v4 = vsub.f32 %v39_v0, %v44_v2 }
  0x82   :  { %v46_v5 = vmul.f32 1.442695, %v45_v4  ;;  %v68_v6 = vsel %vm41_vm0, %v45_v4, 0.0  ;;  %v74_v7 = vmul.f32 %v45_v4, %v40_v3 }
  0x83   :  { %69 = vadd.xlane.f32.xlu1 %v68_v6 }
  0x84   :  { %135 = vpow2.f32 %v46_v5  ;;  %v75_v8 = vsel %vm41_vm0, %v74_v7, 0.0 }
  0x85   :  { %76 = vadd.xlane.f32.xlu2 %v75_v8 }
  0x8a   :  { %v136_v10 = vpop.eup %135 }
  0x8b   :  { %v48_v11 = vsel %vm41_vm0, %v136_v10, 0.0  ;;  %72 = vadd.xlane.f32.xlu1 %v71_v9 }
  0x8c   :  { %49 = vadd.xlane.f32.xlu0 %v48_v11 }
  0xf6   :  { %v70_v35 = vpop.xlane.xlu1 %69 }
  0xf8   :  { %v77_v42 = vpop.xlane.xlu2 %76 }
  0xfe   :  { %v73_v43 = vpop.xlane.xlu1 %72 }
  0xff   :  { %v50_v12 = vpop.xlane.xlu0 %49 }
 0x100   :  { %137 = vrcp.f32 %v50_v12  ;;  %v64_v18 = vand.u32 2147483648, %v50_v12  ;;  %v62_v20 = vand.u32 2147483647, %v50_v12  ;;  %vm58_vm2 = vweird.f32 %v50_v12 }
 0x101   :  { %139 = vlog2.f32 %v86_v15 }
 0x102   :  { %v65_v22 = vor.u32 1.1754944e-38, %v64_v18  ;;  %vm63_vm4 = vcmp.eq.f32.partialorder %v62_v20, 8.507059e+37  ;;  %141 = vlog2.f32 %v50_v12 }
 0x106   :  { %v138_v14 = vpop.eup %137 }
 0x107   :  { %v54_v16 = vmul.f32 %v138_v14, %v50_v12  ;;  %vm59_vm1 = vweird.f32 %v138_v14  ;;  %v140_v24 = vpop.eup %139 }
 0x108   :  { %vm60_vm3 = vmor %vm58_vm2, %vm59_vm1  ;;  %v88_v28 = vmul.f32 0.6931472, %v140_v24  ;;  %v142_v32 = vpop.eup %141 }
 0x109   :  { %v55_v17 = vsub.f32 1.0, %v54_v16  ;;  %v52_v33 = vmul.f32 0.6931472, %v142_v32 }
 0x10b   :  { %v56_v19 = vmul.f32 %v138_v14, %v55_v17  ;;  %v80_v34 = vmul.f32 32.0, %v52_v33  ;;  %v78_v46 = vmul.f32 %v73_v43, %v52_v33 }
 0x10d   :  { %v57_v21 = vadd.f32 %v138_v14, %v56_v19  ;;  %v81_v36 = vsub.f32 %v80_v34, %v70_v35  ;;  %v79_v50 = vsub.f32 %v78_v46, %v77_v42 }
 0x10f   :  { %v61_v23 = vsel %vm60_vm3, %v138_v14, %v57_v21  ;;  %143 = vrcp.f32 %v81_v36  ;;  %v105_v44 = vand.u32 2147483648, %v81_v36  ;;  %vm99_vm6 = vweird.f32 %v81_v36 }
 0x110   :  { %v66_v25 = vsel %vm63_vm4, %v65_v22, %v61_v23  ;;  %v103_v45 = vand.u32 2147483647, %v81_v36 }
 0x111   :  { %v82_v26 = vmul.f32 %v136_v10, %v66_v25  ;;  %v106_v48 = vor.u32 1.1754944e-38, %v105_v44 }
 0x112   :  { %vm104_vm8 = vcmp.eq.f32.partialorder %v103_v45, 8.507059e+37 }
 0x113   :  { %v83_v27 = vmax.f32 %v82_v26, 1e-07 }
 0x115   :  { %v84_v29 = vmin.f32 %v83_v27, 1.0  ;;  %v144_v37 = vpop.eup %143 }
 0x116   :  { %v95_v38 = vmul.f32 %v144_v37, %v81_v36  ;;  %vm100_vm5 = vweird.f32 %v144_v37 }
 0x117   :  { %v89_v30 = vmul.f32 %v88_v28, %v84_v29  ;;  %vm101_vm7 = vmor %vm99_vm6, %vm100_vm5 }
 0x118   :  { %v96_v39 = vsub.f32 1.0, %v95_v38 }
 0x119   :  { %v90_v31 = vsel %vm41_vm0, %v89_v30, 0.0 }
 0x11a   :  { %91 = vadd.xlane.f32.xlu2 %v90_v31  ;;  %v97_v40 = vmul.f32 %v144_v37, %v96_v39 }
 0x11c   :  { %v98_v41 = vadd.f32 %v144_v37, %v97_v40 }
 0x11e   :  { %v102_v47 = vsel %vm101_vm7, %v144_v37, %v98_v41 }
 0x11f   :  { %v107_v49 = vsel %vm104_vm8, %v106_v48, %v102_v47 }
 0x120   :  { %v108_v53 = vmul.f32 %v107_v49, %v79_v50 }
 0x18d   :  { %v92_v51 = vpop.xlane.xlu2 %91 }
 0x18e   :  { %v93_v52 = vsub.f32 0.0, %v92_v51 }
 0x190   :  { %v109_v54 = vadd.f32 %v108_v53, %v93_v52 }
 0x192   :  { %v117_v55 = vrot.slane %v109_v54, 4 }
 0x194   :  { %v118_v57 = vadd.f32 %v117_v55, %v109_v54 }
 0x196   :  { %v119_v58 = vrot.slane %v118_v57, 2 }
 0x198   :  { %v120_v60 = vadd.f32 %v119_v58, %v118_v57 }
 0x19a   :  { %v121_v61 = vrot.slane %v120_v60, 1 }
 0x19c   :  { %v122_v62 = vadd.f32 %v121_v61, %v120_v60 }
 0x19e   :  { %v124_v63 = vsel %vm123_vm9, %v122_v62, 0.0 }
 0x19f   :  { %126 = vst.msk [vmem:[%s231_s2] sm:$0xff] %vm125_vm10, %v124_v63 }
 0x1a0   :  { %131 = vsyncpa [#allocation3], 1 }
 0x1a1   :  { %132 = vsyncpa [#allocation5], 1 }

</bundles_post_ra>
